<compile_context>
chip_gen: v5e
topology: v5e:2x2
jax: 0.10.0
libtpu: 0.0.40
codegen_flags: <defaults>
</compile_context>

<pallas_src>
import functools

import jax
import jax.numpy as jnp
from jax.experimental import pallas as pl
from jax.experimental.pallas import tpu as pltpu

LANE_PAD = 128  # all hidden/output widths are padded to one lane tile


def mlp_kernel(x_ref, w1_ref, wr_ref, b_ref, out_ref):
    """Fused (Linear+ReLU) x5 -> Linear on one batch tile.

    x_ref : (BM, in_features)        f32   (cast to bf16 in-kernel)
    w1_ref: (in_features, 128)       bf16  (layer-1 weight, out-padded)
    wr_ref: (n_rest, 128, 128)       bf16  (layers 2..6, zero-padded)
    b_ref : (8, 128)                 f32   (row i = bias of layer i+1, padded)
    out_ref: (BM, 128)               bf16  (cols >= 10 are zero, sliced outside)
    """
    n_rest = wr_ref.shape[0]  # layers 2..6

    # in-kernel cast: HBM carries x at 4 B/elem once, no separate cast pass.
    x = x_ref[...].astype(jnp.bfloat16)

    # layer 1: Linear -> ReLU  (batchnorm=False => Identity in the reference)
    h = jnp.dot(x, w1_ref[...], preferred_element_type=jnp.float32)
    h = jnp.maximum(h + b_ref[0:1, :], 0.0)

    # layers 2..5: Linear -> ReLU, all at padded width 128 (zero cols stay zero)
    for i in range(n_rest - 1):
        h = jnp.dot(h.astype(jnp.bfloat16), wr_ref[i],
                    preferred_element_type=jnp.float32)
        h = jnp.maximum(h + b_ref[i + 1:i + 2, :], 0.0)

    # final output layer: Linear only (no activation), store bf16 lane-dense
    h = jnp.dot(h.astype(jnp.bfloat16), wr_ref[n_rest - 1],
                preferred_element_type=jnp.float32)
    out_ref[...] = (h + b_ref[n_rest:n_rest + 1, :]).astype(out_ref.dtype)


def pack_params(params):
    """One-time packing of the six (W, b) pairs into 3 lane-dense buffers.

    Call this ONCE when the parameters are created (outside the per-call
    jitted forward).  W's are (in_features, out_features).
    """
    n_layers = len(params)
    in_features, d1 = params[0][0].shape

    w1 = jnp.zeros((in_features, LANE_PAD), jnp.bfloat16)
    w1 = w1.at[:, :d1].set(params[0][0].astype(jnp.bfloat16))

    wr = jnp.zeros((n_layers - 1, LANE_PAD, LANE_PAD), jnp.bfloat16)
    b_pack = jnp.zeros((8, LANE_PAD), jnp.float32)
    b_pack = b_pack.at[0, :d1].set(params[0][1].reshape(-1))
    for i in range(1, n_layers):
        w, b = params[i]
        wr = wr.at[i - 1, :w.shape[0], :w.shape[1]].set(w.astype(jnp.bfloat16))
        b_pack = b_pack.at[i, :w.shape[1]].set(b.reshape(-1))

    n_out = params[-1][0].shape[1]
    return w1, wr, b_pack, n_out


def _round_up(x, m):
    return ((x + m - 1) // m) * m


def _choose_bm(batch, block_batch):
    """Batch-tile size: multiple of 8, tight, and >=2 grid steps when batch is
    big enough for the 'parallel' axis to shard across both v7x TensorCores."""
    batch8 = _round_up(batch, 8)
    min_steps = 2 if batch8 >= 512 else 1
    steps = max(min_steps, pl.cdiv(batch8, block_batch))
    return _round_up(pl.cdiv(batch, steps), 8)


@functools.partial(jax.jit, static_argnames=("n_out", "block_batch"))
def neural_net_mfcc(x, w1, wr, b_pack, *, n_out=10, block_batch=4096):
    """x: (batch, input_shape*16) float32.  w1/wr/b_pack from pack_params."""
    batch, in_features = x.shape
    n_rest = wr.shape[0]

    BM = _choose_bm(batch, block_batch)
    grid = pl.cdiv(batch, BM)

    flops = 2 * grid * BM * (in_features * LANE_PAD
                             + n_rest * LANE_PAD * LANE_PAD)
    bytes_accessed = (batch * in_features * 4       # x (f32, read in-kernel)
                      + w1.size * 2 + wr.size * 2   # bf16 weights
                      + b_pack.size * 4             # f32 biases
                      + batch * LANE_PAD * 2)       # bf16 output
    cost = pl.CostEstimate(flops=flops, transcendentals=0,
                           bytes_accessed=bytes_accessed)

    out = pl.pallas_call(
        mlp_kernel,
        out_shape=jax.ShapeDtypeStruct((batch, LANE_PAD), jnp.bfloat16),
        grid=(grid,),
        in_specs=[
            pl.BlockSpec((BM, in_features), lambda i: (i, 0)),
            # constant index_maps -> weights/biases stay VMEM-resident
            pl.BlockSpec((in_features, LANE_PAD), lambda i: (0, 0)),
            pl.BlockSpec((n_rest, LANE_PAD, LANE_PAD), lambda i: (0, 0, 0)),
            pl.BlockSpec((8, LANE_PAD), lambda i: (0, 0)),
        ],
        out_specs=pl.BlockSpec((BM, LANE_PAD), lambda i: (i, 0)),
        compiler_params=pltpu.CompilerParams(
            dimension_semantics=("parallel",)),
        cost_estimate=cost,
    )(x, w1, wr, b_pack)

    # Tiny downstream ops: drop padded lanes, upcast to the module's f32 dtype.
    return out[:, :n_out].astype(jnp.float32)


def init_params(key, input_shape):
    """Synthetic params matching the PyTorch module shapes.

    Weights ~ N(0, 0.02) (nn.init.normal_(std=0.02)); biases ~ small uniform.
    Stored as (in_features, out_features) (transposed vs PyTorch).
    """
    dims = [input_shape * 16, 20, 15, 15, 12, 12, 10]
    params = []
    for i in range(len(dims) - 1):
        key, kw, kb = jax.random.split(key, 3)
        w = 0.02 * jax.random.normal(kw, (dims[i], dims[i + 1]), jnp.float32)
        bound = 1.0 / jnp.sqrt(dims[i])
        b = jax.random.uniform(kb, (1, dims[i + 1]), jnp.float32,
                               minval=-bound, maxval=bound)
        params.append((w, b))
    return params


def reference_forward_bf16(x, params):
    """Pure-JAX reference with the same bf16-input / f32-accum precision."""
    h = x.astype(jnp.bfloat16)
    for (w, b) in params[:-1]:
        h = jnp.dot(h, w.astype(jnp.bfloat16),
                    preferred_element_type=jnp.float32) + b
        h = jnp.maximum(h, 0.0).astype(jnp.bfloat16)
    w, b = params[-1]
    return jnp.dot(h, w.astype(jnp.bfloat16),
                   preferred_element_type=jnp.float32) + b


def reference_forward_f32(x, params):
    """Full-f32 reference (PyTorch-equivalent math)."""
    h = x
    for (w, b) in params[:-1]:
        h = jnp.maximum(h @ w + b, 0.0)
    w, b = params[-1]
    return h @ w + b


if __name__ == "__main__":
    key = jax.random.PRNGKey(0)
    input_shape = 4          # -> in_features = input_shape * 16 = 64
    batch = 32

    key, kx = jax.random.split(key)
    x = jax.random.normal(kx, (batch, input_shape * 16), dtype=jnp.float32)
    params = init_params(key, input_shape)

    # one-time packing, outside the jitted per-call forward path
    w1, wr, b_pack, n_out = pack_params(params)

    # default path (single grid step at this tiny batch)
    out = neural_net_mfcc(x, w1, wr, b_pack, n_out=n_out)
    out = jax.block_until_ready(out)
    assert out.shape == (batch, 10), out.shape

    ref_bf16 = reference_forward_bf16(x, params)
    assert jnp.allclose(out, ref_bf16, atol=5e-3, rtol=5e-3), \
        "mismatch vs bf16-precision reference"

    ref_f32 = reference_forward_f32(x, params)
    assert jnp.allclose(out, ref_f32, atol=5e-2, rtol=5e-2), \
        "mismatch vs f32 reference"

    # exercise a multi-step pipelined grid with a ragged (non-divisible) batch:
    # block_batch=8 is only to force several tiles at this tiny test size;
    # leave the default (4096) for real workloads.
    xr = x[:27]
    out_r = neural_net_mfcc(xr, w1, wr, b_pack, n_out=n_out, block_batch=8)
    out_r = jax.block_until_ready(out_r)
    assert out_r.shape == (27, 10), out_r.shape
    assert jnp.allclose(out_r, ref_bf16[:27], atol=5e-3, rtol=5e-3), \
        "ragged-batch mismatch vs bf16-precision reference"

    print("KERNEL_OK")
</pallas_src>

<mosaic_0001>
module attributes {stable_mosaic.version = 11 : i64} {
  func.func @mlp_kernel(%arg0: i32, %arg1: memref<32x64xf32, #tpu.memory_space<vmem>>, %arg2: memref<64x128xbf16, #tpu.memory_space<vmem>>, %arg3: memref<5x128x128xbf16, #tpu.memory_space<vmem>>, %arg4: memref<8x128xf32, #tpu.memory_space<vmem>>, %arg5: memref<32x128xbf16, #tpu.memory_space<vmem>>) attributes {dimension_semantics = [#tpu.dimension_semantics<parallel>], iteration_bounds = array<i64: 1>, scalar_prefetch = 0 : i64, scratch_operands = 0 : i64, tpu.core_type = #tpu.core_type<tc>, window_params = [{transform_indices = @transform_0, window_bounds = array<i64: 32, 64>}, {pipeline_mode = #tpu.pipeline_mode<synchronous>, transform_indices = @transform_1, window_bounds = array<i64: 64, 128>}, {pipeline_mode = #tpu.pipeline_mode<synchronous>, transform_indices = @transform_2, window_bounds = array<i64: 5, 128, 128>}, {pipeline_mode = #tpu.pipeline_mode<synchronous>, transform_indices = @transform_3, window_bounds = array<i64: 8, 128>}, {transform_indices = @transform_4, window_bounds = array<i64: 32, 128>}]} {
    %c0 = arith.constant 0 : index
    %c0_0 = arith.constant 0 : index
    %0 = vector.load %arg1[%c0, %c0_0] : memref<32x64xf32, #tpu.memory_space<vmem>>, vector<32x64xf32>
    %1 = arith.truncf %0 : vector<32x64xf32> to vector<32x64xbf16>
    %c0_1 = arith.constant 0 : index
    %c0_2 = arith.constant 0 : index
    %2 = vector.load %arg2[%c0_1, %c0_2] : memref<64x128xbf16, #tpu.memory_space<vmem>>, vector<64x128xbf16>
    %cst = arith.constant dense<0.000000e+00> : vector<32x128xf32>
    %3 = tpu.matmul %1, %2, %cst {dimension_numbers = #tpu.dot_dimension_numbers<[1], [0], [0], [1], [0, 0, 1, 1], [], []>} : vector<32x64xbf16>, vector<64x128xbf16>, vector<32x128xf32> -> vector<32x128xf32>
    %c0_3 = arith.constant 0 : index
    %c0_4 = arith.constant 0 : index
    %4 = vector.load %arg4[%c0_3, %c0_4] : memref<8x128xf32, #tpu.memory_space<vmem>>, vector<1x128xf32>
    %5 = vector.broadcast %4 : vector<1x128xf32> to vector<32x128xf32>
    %6 = arith.addf %3, %5 : vector<32x128xf32>
    %cst_5 = arith.constant 0.000000e+00 : f32
    %7 = vector.broadcast %cst_5 : f32 to vector<32x128xf32>
    %8 = arith.maximumf %6, %7 : vector<32x128xf32>
    %9 = arith.truncf %8 : vector<32x128xf32> to vector<32x128xbf16>
    %c0_6 = arith.constant 0 : index
    %c0_7 = arith.constant 0 : index
    %c0_8 = arith.constant 0 : index
    %10 = vector.load %arg3[%c0_6, %c0_7, %c0_8] : memref<5x128x128xbf16, #tpu.memory_space<vmem>>, vector<1x128x128xbf16>
    %11 = vector.shape_cast %10 : vector<1x128x128xbf16> to vector<128x128xbf16>
    %cst_9 = arith.constant dense<0.000000e+00> : vector<32x128xf32>
    %12 = tpu.matmul %9, %11, %cst_9 {dimension_numbers = #tpu.dot_dimension_numbers<[1], [0], [0], [1], [0, 0, 1, 1], [], []>} : vector<32x128xbf16>, vector<128x128xbf16>, vector<32x128xf32> -> vector<32x128xf32>
    %c1 = arith.constant 1 : index
    %c0_10 = arith.constant 0 : index
    %13 = vector.load %arg4[%c1, %c0_10] : memref<8x128xf32, #tpu.memory_space<vmem>>, vector<1x128xf32>
    %14 = vector.broadcast %13 : vector<1x128xf32> to vector<32x128xf32>
    %15 = arith.addf %12, %14 : vector<32x128xf32>
    %cst_11 = arith.constant 0.000000e+00 : f32
    %16 = vector.broadcast %cst_11 : f32 to vector<32x128xf32>
    %17 = arith.maximumf %15, %16 : vector<32x128xf32>
    %18 = arith.truncf %17 : vector<32x128xf32> to vector<32x128xbf16>
    %c1_12 = arith.constant 1 : index
    %c0_13 = arith.constant 0 : index
    %c0_14 = arith.constant 0 : index
    %19 = vector.load %arg3[%c1_12, %c0_13, %c0_14] : memref<5x128x128xbf16, #tpu.memory_space<vmem>>, vector<1x128x128xbf16>
    %20 = vector.shape_cast %19 : vector<1x128x128xbf16> to vector<128x128xbf16>
    %cst_15 = arith.constant dense<0.000000e+00> : vector<32x128xf32>
    %21 = tpu.matmul %18, %20, %cst_15 {dimension_numbers = #tpu.dot_dimension_numbers<[1], [0], [0], [1], [0, 0, 1, 1], [], []>} : vector<32x128xbf16>, vector<128x128xbf16>, vector<32x128xf32> -> vector<32x128xf32>
    %c2 = arith.constant 2 : index
    %c0_16 = arith.constant 0 : index
    %22 = vector.load %arg4[%c2, %c0_16] : memref<8x128xf32, #tpu.memory_space<vmem>>, vector<1x128xf32>
    %23 = vector.broadcast %22 : vector<1x128xf32> to vector<32x128xf32>
    %24 = arith.addf %21, %23 : vector<32x128xf32>
    %cst_17 = arith.constant 0.000000e+00 : f32
    %25 = vector.broadcast %cst_17 : f32 to vector<32x128xf32>
    %26 = arith.maximumf %24, %25 : vector<32x128xf32>
    %27 = arith.truncf %26 : vector<32x128xf32> to vector<32x128xbf16>
    %c2_18 = arith.constant 2 : index
    %c0_19 = arith.constant 0 : index
    %c0_20 = arith.constant 0 : index
    %28 = vector.load %arg3[%c2_18, %c0_19, %c0_20] : memref<5x128x128xbf16, #tpu.memory_space<vmem>>, vector<1x128x128xbf16>
    %29 = vector.shape_cast %28 : vector<1x128x128xbf16> to vector<128x128xbf16>
    %cst_21 = arith.constant dense<0.000000e+00> : vector<32x128xf32>
    %30 = tpu.matmul %27, %29, %cst_21 {dimension_numbers = #tpu.dot_dimension_numbers<[1], [0], [0], [1], [0, 0, 1, 1], [], []>} : vector<32x128xbf16>, vector<128x128xbf16>, vector<32x128xf32> -> vector<32x128xf32>
    %c3 = arith.constant 3 : index
    %c0_22 = arith.constant 0 : index
    %31 = vector.load %arg4[%c3, %c0_22] : memref<8x128xf32, #tpu.memory_space<vmem>>, vector<1x128xf32>
    %32 = vector.broadcast %31 : vector<1x128xf32> to vector<32x128xf32>
    %33 = arith.addf %30, %32 : vector<32x128xf32>
    %cst_23 = arith.constant 0.000000e+00 : f32
    %34 = vector.broadcast %cst_23 : f32 to vector<32x128xf32>
    %35 = arith.maximumf %33, %34 : vector<32x128xf32>
    %36 = arith.truncf %35 : vector<32x128xf32> to vector<32x128xbf16>
    %c3_24 = arith.constant 3 : index
    %c0_25 = arith.constant 0 : index
    %c0_26 = arith.constant 0 : index
    %37 = vector.load %arg3[%c3_24, %c0_25, %c0_26] : memref<5x128x128xbf16, #tpu.memory_space<vmem>>, vector<1x128x128xbf16>
    %38 = vector.shape_cast %37 : vector<1x128x128xbf16> to vector<128x128xbf16>
    %cst_27 = arith.constant dense<0.000000e+00> : vector<32x128xf32>
    %39 = tpu.matmul %36, %38, %cst_27 {dimension_numbers = #tpu.dot_dimension_numbers<[1], [0], [0], [1], [0, 0, 1, 1], [], []>} : vector<32x128xbf16>, vector<128x128xbf16>, vector<32x128xf32> -> vector<32x128xf32>
    %c4 = arith.constant 4 : index
    %c0_28 = arith.constant 0 : index
    %40 = vector.load %arg4[%c4, %c0_28] : memref<8x128xf32, #tpu.memory_space<vmem>>, vector<1x128xf32>
    %41 = vector.broadcast %40 : vector<1x128xf32> to vector<32x128xf32>
    %42 = arith.addf %39, %41 : vector<32x128xf32>
    %cst_29 = arith.constant 0.000000e+00 : f32
    %43 = vector.broadcast %cst_29 : f32 to vector<32x128xf32>
    %44 = arith.maximumf %42, %43 : vector<32x128xf32>
    %45 = arith.truncf %44 : vector<32x128xf32> to vector<32x128xbf16>
    %c4_30 = arith.constant 4 : index
    %c0_31 = arith.constant 0 : index
    %c0_32 = arith.constant 0 : index
    %46 = vector.load %arg3[%c4_30, %c0_31, %c0_32] : memref<5x128x128xbf16, #tpu.memory_space<vmem>>, vector<1x128x128xbf16>
    %47 = vector.shape_cast %46 : vector<1x128x128xbf16> to vector<128x128xbf16>
    %cst_33 = arith.constant dense<0.000000e+00> : vector<32x128xf32>
    %48 = tpu.matmul %45, %47, %cst_33 {dimension_numbers = #tpu.dot_dimension_numbers<[1], [0], [0], [1], [0, 0, 1, 1], [], []>} : vector<32x128xbf16>, vector<128x128xbf16>, vector<32x128xf32> -> vector<32x128xf32>
    %c5 = arith.constant 5 : index
    %c0_34 = arith.constant 0 : index
    %49 = vector.load %arg4[%c5, %c0_34] : memref<8x128xf32, #tpu.memory_space<vmem>>, vector<1x128xf32>
    %50 = vector.broadcast %49 : vector<1x128xf32> to vector<32x128xf32>
    %51 = arith.addf %48, %50 : vector<32x128xf32>
    %52 = arith.truncf %51 : vector<32x128xf32> to vector<32x128xbf16>
    %c0_35 = arith.constant 0 : index
    %c0_36 = arith.constant 0 : index
    %53 = vector.load %arg5[%c0_35, %c0_36] : memref<32x128xbf16, #tpu.memory_space<vmem>>, vector<32x128xbf16>
    tpu.vector_store %arg5[%c0_35, %c0_36], %52 {strides = array<i32>} : memref<32x128xbf16, #tpu.memory_space<vmem>>, vector<32x128xbf16>,
    return
  }
  func.func @transform_0(%arg0: i32) -> (i32, i32) {
    %c0_i32 = arith.constant 0 : i32
    %c0_i32_0 = arith.constant 0 : i32
    return %arg0, %c0_i32 : i32, i32
  }
  func.func @transform_1(%arg0: i32) -> (i32, i32) {
    %c0_i32 = arith.constant 0 : i32
    %c0_i32_0 = arith.constant 0 : i32
    %c0_i32_1 = arith.constant 0 : i32
    return %c0_i32, %c0_i32_0 : i32, i32
  }
  func.func @transform_2(%arg0: i32) -> (i32, i32, i32) {
    %c0_i32 = arith.constant 0 : i32
    %c0_i32_0 = arith.constant 0 : i32
    %c0_i32_1 = arith.constant 0 : i32
    %c0_i32_2 = arith.constant 0 : i32
    return %c0_i32, %c0_i32_0, %c0_i32_1 : i32, i32, i32
  }
  func.func @transform_3(%arg0: i32) -> (i32, i32) {
    %c0_i32 = arith.constant 0 : i32
    %c0_i32_0 = arith.constant 0 : i32
    %c0_i32_1 = arith.constant 0 : i32
    return %c0_i32, %c0_i32_0 : i32, i32
  }
  func.func @transform_4(%arg0: i32) -> (i32, i32) {
    %c0_i32 = arith.constant 0 : i32
    %c0_i32_0 = arith.constant 0 : i32
    return %arg0, %c0_i32 : i32, i32
  }
}

</mosaic_0001>

<bundles_post_ra>
// kernel: neural_net_mfcc.1
= control target key start
LH: loop header
LB: loop body
LE: loop exit
PB: predicated region body
PF: predicated region fallthrough
CT: control target
= control target key end

     0   :  { %9 = vsyncpa [#allocation3], 0  ;;  %s1027_s0 = inlined_call_operand.hbm [shape: f32[32,64], index: 0, kind: input, shape index: {}]   ;;  %s1028_s1 = inlined_call_operand.hbm [shape: bf16[64,128], index: 1, kind: input, shape index: {}]   ;;  %s1029_s2 = inlined_call_operand.hbm [shape: bf16[5,128,128], index: 2, kind: input, shape index: {}]   ;;  %s1030_s3 = inlined_call_operand.hbm [shape: f32[8,128], index: 3, kind: input, shape index: {}]   ;;  %s1031_s4 = inlined_call_operand.vmem [shape: bf16[32,128], index: 4, kind: output, shape index: {}]  }
   0x1   :  { %10 = vsyncpa [#allocation5], 0  ;;  %s29_s17 = sshll.u32 %s1028_s1, 4  ;;  %s30_s17 = int_to_ptr.hbm [resolvable:$true] %s29_s17 }
   0x2   :  { %11 = vsyncpa [#allocation8], 0  ;;  %s976_s18 = smov [#allocation4]   ;;  %s16_s22 = sshll.u32 %s1027_s0, 4  ;;  %s17_s22 = int_to_ptr.hbm [resolvable:$true] %s16_s22 }
   0x3   :  { %s31_s19 = sshll.u32 %s976_s18, 4  ;;  %s977_s23 = smov 64   ;;  %s32_s19 = int_to_ptr.vmem [resolvable:$true] %s31_s19 }
   0x4   :  { %s978_s24 = smov 4   ;;  %s979_s25 = smov [#allocation2]  }
   0x5   :  { %37 = dma.hbm_to_vmem [thread:$0]  %s30_s17, 512, %s32_s19, [#allocation5], %s977_s23, %s977_s23, %s978_s24  }
   0x6   :  { %s18_s26 = sshll.u32 %s979_s25, 4  ;;  %s980_s27 = smov 128   ;;  %s19_s26 = int_to_ptr.vmem [resolvable:$true] %s18_s26 }
   0x7   :  { %s981_s28 = smov 8   ;;  %s42_s30 = sshll.u32 %s1029_s2, 4  ;;  %s43_s30 = int_to_ptr.hbm [resolvable:$true] %s42_s30 }
   0x8   :  { %24 = dma.hbm_to_vmem [thread:$0]  %s17_s22, 512, %s19_s26, [#allocation3], %s980_s27, %s980_s27, %s981_s28  }
   0x9   :  { %s982_s5 = smov [#allocation6]   ;;  %s56_s8 = sshll.u32 %s1030_s3, 4  ;;  %s57_s8 = int_to_ptr.hbm [resolvable:$true] %s56_s8 }
   0xa   :  { %s44_s6 = sshll.u32 %s982_s5, 4  ;;  %s983_s9 = smov [#allocation7]   ;;  %s45_s6 = int_to_ptr.vmem [resolvable:$true] %s44_s6 }
   0xb   :  { %50 = dma.hbm_to_vmem [thread:$0]  %s43_s30, 5120, %s45_s6, [#allocation5], %s977_s23, %s977_s23, %s978_s24  }
   0xc   :  { %s58_s10 = sshll.u32 %s983_s9, 4  ;;  %s59_s10 = int_to_ptr.vmem [resolvable:$true] %s58_s10 }
   0xd   :  { %61 = dma.hbm_to_vmem [thread:$0]  %s57_s8, 128, %s59_s10, [#allocation8]  }
   0xe   :  { %970 = dma.done.wait [#allocation3], 512  }
   0xf   :  { %971 = vsyncadd [#allocation3], 4294966784 }
  0x10   :  { %972 = dma.done.wait [#allocation5], 5632  }
  0x11   :  { %973 = vsyncadd [#allocation5], 4294961664 }
  0x12   :  { %974 = dma.done.wait [#allocation8], 128  }
  0x13   :  { %975 = vsyncadd [#allocation8], 4294967168  ;;  %v800_v0 = vld [vmem:[#allocation4 + $0x18] sm:$0xff]  ;;  %v799_v1 = vld [vmem:[#allocation4 + $0x10] sm:$0xff]  ;;  %vm119_vm0 = vcmask 523264  }
  0x14   :  { %130 = vmatpush.bf16.msra.mxu0 %v800_v0  ;;  %v808_v2 = vld [vmem:[#allocation6 + $0x38] sm:$0xff]  ;;  %v807_v3 = vld [vmem:[#allocation6 + $0x30] sm:$0xff]  ;;  %v798_v4 = vld [vmem:[#allocation4 + $0x8] sm:$0xff] }
  0x15   :  { %217 = vmatpush.bf16.msra.mxu1 %v808_v2  ;;  %v806_v5 = vld [vmem:[#allocation6 + $0x28] sm:$0xff]  ;;  %v797_v6 = vld [vmem:[#allocation4] sm:$0xff]  ;;  %v81_v11 = vld [vmem:[#allocation2 + $0x10] sm:$0xff] }
  0x16   :  { %v79_v7 = vld [vmem:[#allocation2] sm:$0xff]  ;;  %v80_v8 = vld [vmem:[#allocation2 + $0x8] sm:$0xff]  ;;  %v82_v12 = vld [vmem:[#allocation2 + $0x18] sm:$0xff] }
  0x17   :  { %v805_v9 = vld [vmem:[#allocation6 + $0x20] sm:$0xff]  ;;  %v83_v10 = vpack.c.bf16 %v80_v8, %v79_v7  ;;  %v84_v13 = vpack.c.bf16 %v82_v12, %v81_v11  ;;  %v804_v14 = vld [vmem:[#allocation6 + $0x18] sm:$0xff]  ;;  %v803_v15 = vld [vmem:[#allocation6 + $0x10] sm:$0xff] }
  0x18   :  { %131 = vmatpush.bf16.msra.mxu0 %v799_v1  ;;  %v802_v16 = vld [vmem:[#allocation6 + $0x8] sm:$0xff]  ;;  %v801_v17 = vld [vmem:[#allocation6] sm:$0xff]  ;;  %v816_v18 = vld [vmem:[#allocation6 + $0x78] sm:$0xff] }
  0x19   :  { %218 = vmatpush.bf16.msra.mxu1 %v807_v3  ;;  %309 = vmatpush.bf16.msra.mxu2 %v816_v18  ;;  %v815_v20 = vld [vmem:[#allocation6 + $0x70] sm:$0xff]  ;;  %v868_v21 = vld [vmem:[#allocation7] ss:$0 sm:$0xff]  ;;  %v814_v22 = vld [vmem:[#allocation6 + $0x68] sm:$0xff] }
  0x1a   :  { %v813_v26 = vld [vmem:[#allocation6 + $0x60] sm:$0xff]  ;;  %v812_v37 = vld [vmem:[#allocation6 + $0x58] sm:$0xff]  ;;  %v811_v38 = vld [vmem:[#allocation6 + $0x50] sm:$0xff] }
  0x1b   :  { %v810_v39 = vld [vmem:[#allocation6 + $0x48] sm:$0xff]  ;;  %v809_v40 = vld [vmem:[#allocation6 + $0x40] sm:$0xff]  ;;  %v824_v41 = vld [vmem:[#allocation6 + $0xb8] sm:$0xff] }
  0x1c   :  { %132 = vmatpush.bf16.msra.mxu0 %v798_v4  ;;  %401 = vmatpush.bf16.msra.mxu3 %v824_v41  ;;  %v823_v43 = vld [vmem:[#allocation6 + $0xb0] sm:$0xff]  ;;  %v869_v44 = vld [vmem:[#allocation7 + $0x1] ss:$0 sm:$0xff]  ;;  %v822_v45 = vld [vmem:[#allocation6 + $0xa8] sm:$0xff] }
  0x1d   :  { %219 = vmatpush.bf16.msra.mxu1 %v806_v5  ;;  %310 = vmatpush.bf16.msra.mxu2 %v815_v20  ;;  %v821_v49 = vld [vmem:[#allocation6 + $0xa0] sm:$0xff]  ;;  %v820_v60 = vld [vmem:[#allocation6 + $0x98] sm:$0xff]  ;;  %v819_v61 = vld [vmem:[#allocation6 + $0x90] sm:$0xff] }
  0x1e   :  { %v818_v62 = vld [vmem:[#allocation6 + $0x88] sm:$0xff]  ;;  %v817_v63 = vld [vmem:[#allocation6 + $0x80] sm:$0xff]  ;;  %v832_v0 = vld [vmem:[#allocation6 + $0xf8] sm:$0xff] }
  0x1f   :  { %v831_v2 = vld [vmem:[#allocation6 + $0xf0] sm:$0xff]  ;;  %v870_v3 = vld [vmem:[#allocation7 + $0x2] ss:$0 sm:$0xff]  ;;  %v830_v4 = vld [vmem:[#allocation6 + $0xe8] sm:$0xff] }
  0x20   :  { %133 = vmatpush.bf16.msra.mxu0 %v797_v6  ;;  %402 = vmatpush.bf16.msra.mxu3 %v823_v43  ;;  %v829_v8 = vld [vmem:[#allocation6 + $0xe0] sm:$0xff]  ;;  %v828_v12 = vld [vmem:[#allocation6 + $0xd8] sm:$0xff]  ;;  %v827_v20 = vld [vmem:[#allocation6 + $0xd0] sm:$0xff] }
  0x21   :  { %220 = vmatpush.bf16.msra.mxu1 %v805_v9  ;;  %311 = vmatpush.bf16.msra.mxu2 %v814_v22  ;;  %v825_v22 = vld [vmem:[#allocation6 + $0xc0] sm:$0xff]  ;;  %v835_v43 = vld [vmem:[#allocation6 + $0x110] sm:$0xff] }
  0x23   :  { %635 = vmatmul.msk.bf16.vlgmr.msra.gmra.mxu0 %vm119_vm0, %v83_v10 }
  0x24   :  { %403 = vmatpush.bf16.msra.mxu3 %v822_v45  ;;  %493 = vmatpush.bf16.msrb.mxu0 %v832_v0  ;;  %v833_v45 = vld [vmem:[#allocation6 + $0x100] sm:$0xff] }
  0x25   :  { %221 = vmatpush.bf16.msra.mxu1 %v804_v14  ;;  %312 = vmatpush.bf16.msra.mxu2 %v813_v26  ;;  %v871_v26 = vld [vmem:[#allocation7 + $0x3] ss:$0 sm:$0xff] }
  0x28   :  { %404 = vmatpush.bf16.msra.mxu3 %v821_v49  ;;  %494 = vmatpush.bf16.msrb.mxu0 %v831_v2 }
  0x29   :  { %222 = vmatpush.bf16.msra.mxu1 %v803_v15  ;;  %313 = vmatpush.bf16.msra.mxu2 %v812_v37 }
  0x2c   :  { %405 = vmatpush.bf16.msra.mxu3 %v820_v60  ;;  %495 = vmatpush.bf16.msrb.mxu0 %v830_v4 }
  0x2d   :  { %223 = vmatpush.bf16.msra.mxu1 %v802_v16  ;;  %314 = vmatpush.bf16.msra.mxu2 %v811_v38 }
  0x30   :  { %406 = vmatpush.bf16.msra.mxu3 %v819_v61  ;;  %496 = vmatpush.bf16.msrb.mxu0 %v829_v8 }
  0x31   :  { %224 = vmatpush.bf16.msra.mxu1 %v801_v17  ;;  %315 = vmatpush.bf16.msra.mxu2 %v810_v39 }
  0x33   :  { %636 = vmatmul.msk.bf16.gmra.mxu0 %vm119_vm0, %v84_v13 }
  0x34   :  { %407 = vmatpush.bf16.msra.mxu3 %v818_v62  ;;  %497 = vmatpush.bf16.msrb.mxu0 %v828_v12  ;;  %v873_v62 = vld [vmem:[#allocation7 + $0x5] ss:$0 sm:$0xff] }
  0x35   :  { %316 = vmatpush.bf16.msra.mxu2 %v809_v40 }
  0x38   :  { %408 = vmatpush.bf16.msra.mxu3 %v817_v63  ;;  %498 = vmatpush.bf16.msrb.mxu0 %v827_v20 }
  0xa0   :  { %v135_v19 = vpop.f32.mrf.mxu0 }
  0xa1   :  { %v136_v23 = vadd.f32 %v868_v21, %v135_v19 }
  0xa3   :  { %v145_v27 = vmax.f32 %v136_v23, 0.0  ;;  %v840_v23 = vld [vmem:[#allocation6 + $0x138] sm:$0xff] }
  0xa4   :  { %585 = vmatpush.bf16.msrb.mxu1 %v840_v23  ;;  %852 = vmatpush.bf16.msrb.mxu2 %v840_v23 }
  0xa8   :  { %v137_v24 = vpop.f32.mrf.mxu0 }
  0xa9   :  { %v138_v25 = vadd.f32 %v868_v21, %v137_v24 }
  0xab   :  { %v146_v28 = vmax.f32 %v138_v25, 0.0  ;;  %v839_v25 = vld [vmem:[#allocation6 + $0x130] sm:$0xff] }
  0xac   :  { %586 = vmatpush.bf16.msrb.mxu1 %v839_v25  ;;  %853 = vmatpush.bf16.msrb.mxu2 %v839_v25 }
  0xad   :  { %v149_v29 = vpack.c.bf16 %v146_v28, %v145_v27  ;;  %v838_v27 = vld [vmem:[#allocation6 + $0x128] sm:$0xff] }
  0xaf   :  { %225 = vmatmul.bf16.vlgmr.msra.gmra.mxu1 %v149_v29 }
  0xb0   :  { %v140_v30 = vpop.f32.mrf.mxu0  ;;  %587 = vmatpush.bf16.msrb.mxu1 %v838_v27  ;;  %854 = vmatpush.bf16.msrb.mxu2 %v838_v27 }
  0xb1   :  { %v141_v31 = vadd.f32 %v868_v21, %v140_v30 }
  0xb3   :  { %v147_v34 = vmax.f32 %v141_v31, 0.0  ;;  %v837_v31 = vld [vmem:[#allocation6 + $0x120] sm:$0xff] }
  0xb4   :  { %588 = vmatpush.bf16.msrb.mxu1 %v837_v31  ;;  %855 = vmatpush.bf16.msrb.mxu2 %v837_v31 }
  0xb8   :  { %v142_v32 = vpop.f32.mrf.mxu0 }
  0xb9   :  { %v143_v33 = vadd.f32 %v868_v21, %v142_v32  ;;  %v826_v21 = vld [vmem:[#allocation6 + $0xc8] sm:$0xff] }
  0xba   :  { %499 = vmatpush.bf16.msrb.mxu0 %v826_v21 }
  0xbb   :  { %v148_v35 = vmax.f32 %v143_v33, 0.0 }
  0xbd   :  { %v150_v36 = vpack.c.bf16 %v148_v35, %v147_v34 }
  0xbe   :  { %500 = vmatpush.bf16.msrb.mxu0 %v825_v22 }
  0xbf   :  { %230 = vmatmul.bf16.gmra.mxu1 %v150_v36 }
 0x12c   :  { %v226_v42 = vpop.f32.mrf.mxu1 }
 0x12d   :  { %v227_v46 = vadd.f32 %v869_v44, %v226_v42  ;;  %v836_v42 = vld [vmem:[#allocation6 + $0x118] sm:$0xff] }
 0x12e   :  { %589 = vmatpush.bf16.msrb.mxu1 %v836_v42  ;;  %856 = vmatpush.bf16.msrb.mxu2 %v836_v42 }
 0x12f   :  { %v236_v50 = vmax.f32 %v227_v46, 0.0 }
 0x132   :  { %590 = vmatpush.bf16.msrb.mxu1 %v835_v43  ;;  %857 = vmatpush.bf16.msrb.mxu2 %v835_v43 }
 0x134   :  { %v228_v47 = vpop.f32.mrf.mxu1 }
 0x135   :  { %v229_v48 = vadd.f32 %v869_v44, %v228_v47  ;;  %v872_v47 = vld [vmem:[#allocation7 + $0x4] ss:$0 sm:$0xff] }
 0x137   :  { %v237_v51 = vmax.f32 %v229_v48, 0.0 }
 0x139   :  { %v240_v52 = vpack.c.bf16 %v237_v51, %v236_v50 }
 0x13b   :  { %317 = vmatmul.bf16.vlgmr.msra.gmra.mxu2 %v240_v52 }
 0x13c   :  { %v231_v53 = vpop.f32.mrf.mxu1 }
 0x13d   :  { %v232_v54 = vadd.f32 %v869_v44, %v231_v53 }
 0x13f   :  { %v238_v57 = vmax.f32 %v232_v54, 0.0 }
 0x144   :  { %v233_v55 = vpop.f32.mrf.mxu1 }
 0x145   :  { %v234_v56 = vadd.f32 %v869_v44, %v233_v55  ;;  %v834_v44 = vld [vmem:[#allocation6 + $0x108] sm:$0xff] }
 0x146   :  { %591 = vmatpush.bf16.msrb.mxu1 %v834_v44  ;;  %858 = vmatpush.bf16.msrb.mxu2 %v834_v44 }
 0x147   :  { %v239_v58 = vmax.f32 %v234_v56, 0.0 }
 0x149   :  { %v241_v59 = vpack.c.bf16 %v239_v58, %v238_v57 }
 0x14a   :  { %592 = vmatpush.bf16.msrb.mxu1 %v833_v45  ;;  %859 = vmatpush.bf16.msrb.mxu2 %v833_v45 }
 0x14b   :  { %322 = vmatmul.bf16.gmra.mxu2 %v241_v59 }
 0x1be   :  { %v318_v1 = vpop.f32.mrf.mxu2 }
 0x1bf   :  { %v319_v5 = vadd.f32 %v870_v3, %v318_v1 }
 0x1c1   :  { %v328_v9 = vmax.f32 %v319_v5, 0.0 }
 0x1c6   :  { %v320_v6 = vpop.f32.mrf.mxu2 }
 0x1c7   :  { %v321_v7 = vadd.f32 %v870_v3, %v320_v6 }
 0x1c9   :  { %v329_v10 = vmax.f32 %v321_v7, 0.0 }
 0x1cb   :  { %v332_v11 = vpack.c.bf16 %v329_v10, %v328_v9 }
 0x1cd   :  { %409 = vmatmul.bf16.vlgmr.msra.gmra.mxu3 %v332_v11 }
 0x1ce   :  { %v323_v13 = vpop.f32.mrf.mxu2 }
 0x1cf   :  { %v324_v14 = vadd.f32 %v870_v3, %v323_v13 }
 0x1d1   :  { %v330_v17 = vmax.f32 %v324_v14, 0.0 }
 0x1d6   :  { %v325_v15 = vpop.f32.mrf.mxu2 }
 0x1d7   :  { %v326_v16 = vadd.f32 %v870_v3, %v325_v15 }
 0x1d9   :  { %v331_v18 = vmax.f32 %v326_v16, 0.0 }
 0x1db   :  { %v333_v19 = vpack.c.bf16 %v331_v18, %v330_v17 }
 0x1dd   :  { %414 = vmatmul.bf16.gmra.mxu3 %v333_v19 }
 0x250   :  { %v410_v24 = vpop.f32.mrf.mxu3 }
 0x251   :  { %v411_v28 = vadd.f32 %v871_v26, %v410_v24 }
 0x253   :  { %v420_v32 = vmax.f32 %v411_v28, 0.0 }
 0x258   :  { %v412_v29 = vpop.f32.mrf.mxu3 }
 0x259   :  { %v413_v30 = vadd.f32 %v871_v26, %v412_v29 }
 0x25b   :  { %v421_v33 = vmax.f32 %v413_v30, 0.0 }
 0x25d   :  { %v424_v34 = vpack.c.bf16 %v421_v33, %v420_v32 }
 0x25f   :  { %501 = vmatmul.bf16.vlgmr.msrb.gmra.mxu0 %v424_v34 }
 0x260   :  { %v415_v35 = vpop.f32.mrf.mxu3 }
 0x261   :  { %v416_v36 = vadd.f32 %v871_v26, %v415_v35 }
 0x263   :  { %v422_v39 = vmax.f32 %v416_v36, 0.0 }
 0x268   :  { %v417_v37 = vpop.f32.mrf.mxu3 }
 0x269   :  { %v418_v38 = vadd.f32 %v871_v26, %v417_v37 }
 0x26b   :  { %v423_v40 = vmax.f32 %v418_v38, 0.0 }
 0x26d   :  { %v425_v41 = vpack.c.bf16 %v423_v40, %v422_v39 }
 0x26f   :  { %506 = vmatmul.bf16.gmra.mxu0 %v425_v41 }
 0x2dc   :  { %v502_v46 = vpop.f32.mrf.mxu0 }
 0x2dd   :  { %v503_v48 = vadd.f32 %v872_v47, %v502_v46 }
 0x2df   :  { %v512_v51 = vmax.f32 %v503_v48, 0.0 }
 0x2e4   :  { %v504_v49 = vpop.f32.mrf.mxu0 }
 0x2e5   :  { %v505_v50 = vadd.f32 %v872_v47, %v504_v49 }
 0x2e7   :  { %v513_v52 = vmax.f32 %v505_v50, 0.0 }
 0x2e9   :  { %v516_v53 = vpack.c.bf16 %v513_v52, %v512_v51 }
 0x2eb   :  { %593 = vmatmul.bf16.vlgmr.msrb.gmra.mxu1 %v516_v53 }
 0x2ec   :  { %v507_v54 = vpop.f32.mrf.mxu0 }
 0x2ed   :  { %v508_v55 = vadd.f32 %v872_v47, %v507_v54 }
 0x2ef   :  { %v514_v58 = vmax.f32 %v508_v55, 0.0 }
 0x2f4   :  { %v509_v56 = vpop.f32.mrf.mxu0 }
 0x2f5   :  { %v510_v57 = vadd.f32 %v872_v47, %v509_v56 }
 0x2f7   :  { %v515_v59 = vmax.f32 %v510_v57, 0.0 }
 0x2f9   :  { %v517_v60 = vpack.c.bf16 %v515_v59, %v514_v58 }
 0x2fb   :  { %598 = vmatmul.bf16.vlgmr.msrb.gmra.mxu2 %v517_v60 }
 0x368   :  { %v594_v61 = vpop.f32.mrf.mxu1 }
 0x369   :  { %v595_v0 = vadd.f32 %v873_v62, %v594_v61 }
 0x370   :  { %v596_v63 = vpop.f32.mrf.mxu1 }
 0x371   :  { %v597_v1 = vadd.f32 %v873_v62, %v596_v63 }
 0x373   :  { %v844_v2 = vpack.c.bf16 %v597_v1, %v595_v0 }
 0x375   :  { %845 = vst [vmem:[%s1031_s4] sm:$0xff] %v844_v2  }
 0x37e   :  { %v599_v3 = vpop.f32.mrf.mxu2 }
 0x37f   :  { %v600_v5 = vadd.f32 %v873_v62, %v599_v3 }
 0x386   :  { %v601_v4 = vpop.f32.mrf.mxu2 }
 0x387   :  { %v602_v6 = vadd.f32 %v873_v62, %v601_v4 }
 0x389   :  { %v849_v7 = vpack.c.bf16 %v602_v6, %v600_v5 }
 0x38b   :  { %851 = vst [vmem:[%s1031_s4 + $0x8] sm:$0xff] %v849_v7  }
 0x38c   :  { %616 = vsyncpa [#allocation3], 1 }
 0x38d   :  { %617 = vsyncpa [#allocation5], 1 }
 0x38e   :  { %618 = vsyncpa [#allocation8], 1 }

</bundles_post_ra>
